<compile_context>
chip_gen: v7x
topology: tpu7x:2x2x1
jax: 0.10.0
libtpu: 0.0.40
codegen_flags: <defaults>
</compile_context>

<pallas_src>
import functools
import math

import jax
import jax.numpy as jnp
from jax import lax
from jax.experimental import pallas as pl
from jax.experimental.pallas import tpu as pltpu


def _round_up(x, m):
    return ((x + m - 1) // m) * m


def _vmem_capacity_bytes():
    """Physical per-TensorCore VMEM; conservative 64 MiB (v7x) fallback."""
    try:
        return int(pltpu.get_tpu_info().vmem_capacity_bytes)
    except Exception:
        return 64 << 20


def _default_ew_dtype(compute_dtype):
    """Elementwise (bias + GELU) dtype: bf16 only where the VPU/EUP natively
    support it (v6e/v7x); v5-and-older keep f32 (bf16 would only add
    pack/unpack work there)."""
    if jnp.dtype(compute_dtype) != jnp.dtype(jnp.bfloat16):
        return jnp.float32
    kind = ""
    try:
        kind = jax.devices()[0].device_kind.lower()
    except Exception:
        pass
    for old in ("v2", "v3", "v4", "v5"):
        if old in kind:
            return jnp.float32
    return jnp.bfloat16


def _pick_tile_f(ffn_dim, dim, cbytes, vmem_cap):
    # ~3/16 of VMEM for raw weight bytes: ~24 MiB on v5e/v6e (128 MiB VMEM),
    # ~12 MiB on v7x (64 MiB).  Within budget -> single F chunk so W1/W2 are
    # DMA'd from HBM exactly once for the whole call.
    budget = (vmem_cap * 3) // 16
    if 2 * dim * ffn_dim * cbytes <= budget:
        return ffn_dim
    # Otherwise stream the FFN dim in lane-aligned chunks sized so a
    # double-buffered W1/W2 chunk pair stays within the budget.
    for cand in (2048, 1024, 512, 256, 128):
        if ffn_dim % cand == 0 and 2 * (2 * dim * cand * cbytes) <= budget:
            return cand
    return 128 if ffn_dim % 128 == 0 else ffn_dim


def _pick_tile_rows(n, dim, act_bytes, vmem_cap, row_mult):
    # x + out, each double-buffered: 4 * tile_rows * dim * act_bytes should fit
    # in ~25% of VMEM; cap at 512 rows (amortizes per-grid-step overhead).
    budget = vmem_cap // 4
    cap = budget // max(1, 4 * dim * act_bytes)
    cap = max(row_mult, min(512, (cap // row_mult) * row_mult))
    n_r = _round_up(n, row_mult)
    if n_r <= cap:
        return n_r
    # Prefer a tile that divides N exactly -> no wrapper-side pad copy.
    t = cap
    while t >= row_mult:
        if n % t == 0:
            return t
        t -= row_mult
    return cap


def _gelu_exact(h):
    # Exact (erf-based) GELU, matching nn.GELU() defaults; runs in h.dtype.
    return 0.5 * h * (1.0 + lax.erf(h * (1.0 / math.sqrt(2.0))))


def _layernorm_f32(x_ref, gamma_ref, beta_ref, eps):
    x = x_ref[...].astype(jnp.float32)
    mean = jnp.mean(x, axis=-1, keepdims=True)
    xc = x - mean
    var = jnp.mean(xc * xc, axis=-1, keepdims=True)
    xn = xc * lax.rsqrt(var + eps)
    xn = xn * gamma_ref[...].astype(jnp.float32) \
        + beta_ref[...].astype(jnp.float32)
    return x, xn


def _ffn_kernel_fused(x_ref, gamma_ref, beta_ref, w1_ref, b1_ref, w2_ref,
                      b2_ref, o_ref, *, eps, ew_dtype):
    """n_f == 1: full W1/W2 resident; LN -> lin1 -> GELU -> lin2 -> +b2 ->
    +residual entirely in registers, one store."""
    compute_dtype = w1_ref.dtype
    x, xn = _layernorm_f32(x_ref, gamma_ref, beta_ref, eps)

    h = jnp.dot(xn.astype(compute_dtype), w1_ref[...],
                preferred_element_type=jnp.float32)
    h = h.astype(ew_dtype) + b1_ref[...].astype(ew_dtype)
    g = _gelu_exact(h)

    y = jnp.dot(g.astype(compute_dtype), w2_ref[...],
                preferred_element_type=jnp.float32)
    # TODO(synk): dropout skipped (module evaluated with training=False, where
    # F.dropout is the identity).
    y = y + b2_ref[...].astype(jnp.float32) + x
    o_ref[...] = y.astype(o_ref.dtype)


def _ffn_kernel_stream(x_ref, gamma_ref, beta_ref, w1_ref, b1_ref, w2_ref,
                       b2_ref, o_ref, xn_ref, acc_ref, *, eps, ew_dtype):
    """n_f > 1: F dim streamed on an inner 'arbitrary' axis with a (tm, D) f32
    accumulator; LayerNorm computed once per row tile (f == 0)."""
    f = pl.program_id(1)
    n_f = pl.num_programs(1)
    compute_dtype = w1_ref.dtype

    @pl.when(f == 0)
    def _():
        _, xn = _layernorm_f32(x_ref, gamma_ref, beta_ref, eps)
        xn_ref[...] = xn.astype(xn_ref.dtype)
        acc_ref[...] = jnp.zeros_like(acc_ref)

    h = jnp.dot(xn_ref[...], w1_ref[...], preferred_element_type=jnp.float32)
    h = h.astype(ew_dtype) + b1_ref[...].astype(ew_dtype)
    g = _gelu_exact(h)
    acc_ref[...] += jnp.dot(g.astype(compute_dtype), w2_ref[...],
                            preferred_element_type=jnp.float32)

    @pl.when(f == n_f - 1)
    def _():
        # TODO(synk): dropout skipped (eval mode -> identity).
        y = acc_ref[...] + b2_ref[...].astype(jnp.float32)
        o_ref[...] = (y + x_ref[...].astype(jnp.float32)).astype(o_ref.dtype)


def ffn_forward(src, gamma, beta, w1, b1, w2, b2, *, eps=1e-5,
                tile_rows=None, tile_f=None, elementwise_dtype=None):
    """Fused FFN block.  src: [N, D] -> [N, D].

    Weights must be pre-transposed to [in, out] and pre-cast ONCE (at
    parameter-setup time) to the desired MXU operand dtype (bf16 for perf,
    f32 for exactness); the kernel consumes them as-is, so no per-call cast
    op is emitted.
    """
    n, dim = src.shape
    ffn_dim = w1.shape[1]
    compute_dtype = w1.dtype
    cbytes = jnp.dtype(compute_dtype).itemsize
    xbytes = jnp.dtype(src.dtype).itemsize
    ew_dtype = (_default_ew_dtype(compute_dtype)
                if elementwise_dtype is None else elementwise_dtype)

    vmem_cap = _vmem_capacity_bytes()
    row_mult = 16 if jnp.dtype(compute_dtype) == jnp.dtype(jnp.bfloat16) else 8

    if tile_f is None:
        tile_f = _pick_tile_f(ffn_dim, dim, cbytes, vmem_cap)
    tile_f = int(tile_f)
    if ffn_dim % tile_f != 0:
        tile_f = ffn_dim
    n_f = ffn_dim // tile_f

    if tile_rows is None:
        tile_rows = _pick_tile_rows(n, dim, xbytes, vmem_cap, row_mult)
    tile_rows = max(row_mult, _round_up(int(tile_rows), row_mult))

    n_pad = _round_up(n, tile_rows)
    src_p = src if n_pad == n else jnp.pad(src, ((0, n_pad - n), (0, 0)))
    n_rows = n_pad // tile_rows

    flops = int(4 * n_pad * dim * ffn_dim)
    trans = int(n_pad * ffn_dim)

    if n_f == 1:
        kernel = functools.partial(_ffn_kernel_fused, eps=eps, ew_dtype=ew_dtype)
        grid = (n_rows,)
        in_specs = [
            pl.BlockSpec((tile_rows, dim), lambda i: (i, 0)),        # x
            pl.BlockSpec((1, dim), lambda i: (0, 0)),                # gamma
            pl.BlockSpec((1, dim), lambda i: (0, 0)),                # beta
            pl.BlockSpec((dim, ffn_dim), lambda i: (0, 0)),          # W1
            pl.BlockSpec((1, ffn_dim), lambda i: (0, 0)),            # b1
            pl.BlockSpec((ffn_dim, dim), lambda i: (0, 0)),          # W2
            pl.BlockSpec((1, dim), lambda i: (0, 0)),                # b2
        ]
        out_specs = pl.BlockSpec((tile_rows, dim), lambda i: (i, 0))
        scratch_shapes = []
        semantics = ("parallel",)
        block_bytes = (4 * tile_rows * dim * xbytes          # x + out (2x buf)
                       + 4 * dim * ffn_dim * cbytes          # W1 + W2 (2x buf)
                       + 2 * (ffn_dim + 3 * dim) * 4)
        bytes_accessed = int(2 * n_pad * dim * xbytes
                             + 2 * dim * ffn_dim * cbytes
                             + (ffn_dim + 3 * dim) * 4)
    else:
        kernel = functools.partial(_ffn_kernel_stream, eps=eps, ew_dtype=ew_dtype)
        grid = (n_rows, n_f)

        def f_serp(i, f):
            # Serpentine the F axis per row tile so the weight chunk resident
            # in VMEM at a row-tile boundary is reused (no cold weight DMA).
            return jnp.where(i % 2 == 0, f, n_f - 1 - f)

        in_specs = [
            pl.BlockSpec((tile_rows, dim), lambda i, f: (i, 0)),           # x
            pl.BlockSpec((1, dim), lambda i, f: (0, 0)),                   # gamma
            pl.BlockSpec((1, dim), lambda i, f: (0, 0)),                   # beta
            pl.BlockSpec((dim, tile_f), lambda i, f: (0, f_serp(i, f))),   # W1
            pl.BlockSpec((1, tile_f), lambda i, f: (0, f_serp(i, f))),     # b1
            pl.BlockSpec((tile_f, dim), lambda i, f: (f_serp(i, f), 0)),   # W2
            pl.BlockSpec((1, dim), lambda i, f: (0, 0)),                   # b2
        ]
        out_specs = pl.BlockSpec((tile_rows, dim), lambda i, f: (i, 0))
        scratch_shapes = [
            pltpu.VMEM((tile_rows, dim), compute_dtype),   # xn (LN output)
            pltpu.VMEM((tile_rows, dim), jnp.float32),     # lin2 accumulator
        ]
        semantics = ("parallel", "arbitrary")
        block_bytes = (4 * tile_rows * dim * xbytes
                       + 4 * dim * tile_f * cbytes
                       + 2 * (tile_f + 3 * dim) * 4
                       + tile_rows * dim * (cbytes + 4))
        bytes_accessed = int(2 * n_pad * dim * xbytes
                             + 2 * n_rows * dim * ffn_dim * cbytes
                             + (ffn_dim + 3 * dim) * 4)

    # Clamp the requested VMEM to ~85% of physical capacity (v7x-safe).
    vmem_cap85 = int(vmem_cap * 0.85)
    vmem_limit = max(min(int(block_bytes * 1.25) + (2 << 20), vmem_cap85),
                     min(32 << 20, vmem_cap85))

    out = pl.pallas_call(
        kernel,
        out_shape=jax.ShapeDtypeStruct((n_pad, dim), src.dtype),
        grid_spec=pltpu.PrefetchScalarGridSpec(
            num_scalar_prefetch=0,
            grid=grid,
            in_specs=in_specs,
            out_specs=out_specs,
            scratch_shapes=scratch_shapes,
        ),
        compiler_params=pltpu.CompilerParams(
            dimension_semantics=semantics,
            vmem_limit_bytes=vmem_limit,
        ),
        cost_estimate=pl.CostEstimate(
            flops=flops,
            transcendentals=trans,
            bytes_accessed=bytes_accessed,
        ),
    )(src_p, gamma, beta, w1, b1, w2, b2)

    return out[:n] if n_pad != n else out


def init_ffn_params(key, dim_h):
    """Deterministic init mirroring nn.Linear.reset_parameters shapes.

    lin1: Linear(dim_h, dim_h), lin2: Linear(dim_h, dim_h).
    LayerNorm: gamma=1, beta=0 (PyTorch default).
    Weights are returned pre-transposed to [in, out], in f32.
    """
    k1, k2, k3, k4 = jax.random.split(key, 4)
    bound = 1.0 / math.sqrt(dim_h)
    w1 = jax.random.uniform(k1, (dim_h, dim_h), jnp.float32, -bound, bound)
    b1 = jax.random.uniform(k2, (1, dim_h), jnp.float32, -bound, bound)
    w2 = jax.random.uniform(k3, (dim_h, dim_h), jnp.float32, -bound, bound)
    b2 = jax.random.uniform(k4, (1, dim_h), jnp.float32, -bound, bound)
    gamma = jnp.ones((1, dim_h), jnp.float32)
    beta = jnp.zeros((1, dim_h), jnp.float32)
    return gamma, beta, w1, b1, w2, b2


def ffn_reference(src, gamma, beta, w1, b1, w2, b2, eps=1e-5):
    """Pure-JAX f32 reference for correctness checking."""
    x = src.astype(jnp.float32)
    mean = jnp.mean(x, axis=-1, keepdims=True)
    var = jnp.mean((x - mean) ** 2, axis=-1, keepdims=True)
    xn = (x - mean) / jnp.sqrt(var + eps) * gamma + beta
    h = xn @ w1 + b1
    h = 0.5 * h * (1.0 + lax.erf(h / math.sqrt(2.0)))
    y = h @ w2 + b2
    return (y + x).astype(src.dtype)


if __name__ == "__main__":
    key = jax.random.PRNGKey(0)
    k_x, k_p, k_x2, k_p2 = jax.random.split(key, 4)

    # ---- small config matching the module: 8 tokens/nodes, dim_h = 32 ----
    N, dim_h = 8, 32
    src = jax.random.normal(k_x, (N, dim_h), jnp.float32)
    gamma, beta, w1, b1, w2, b2 = init_ffn_params(k_p, dim_h)
    ref = ffn_reference(src, gamma, beta, w1, b1, w2, b2)

    # f32 MXU path (weights passed as-is): fused n_f == 1 kernel, tight tol.
    out_f32 = jax.block_until_ready(
        ffn_forward(src, gamma, beta, w1, b1, w2, b2))
    assert out_f32.shape == (N, dim_h)
    assert jnp.allclose(out_f32, ref, atol=1e-4, rtol=1e-4), "f32 mismatch"

    # bf16 MXU path: weights cast ONCE here (parameter-setup time), not per call.
    w1b, w2b = w1.astype(jnp.bfloat16), w2.astype(jnp.bfloat16)
    out_bf16 = jax.block_until_ready(
        ffn_forward(src, gamma, beta, w1b, b1, w2b, b2))
    assert out_bf16.shape == (N, dim_h)
    assert jnp.allclose(out_bf16, ref, atol=5e-2, rtol=5e-2), "bf16 mismatch"

    # Streaming (n_f > 1) path: force lane-aligned F chunks so the
    # accumulator + serpentine weight-index path is exercised as well.
    N2, dim_h2 = 32, 256
    src2 = jax.random.normal(k_x2, (N2, dim_h2), jnp.float32)
    params2 = init_ffn_params(k_p2, dim_h2)
    ref2 = ffn_reference(src2, *params2)
    out2 = jax.block_until_ready(
        ffn_forward(src2, *params2, tile_rows=16, tile_f=128))
    assert out2.shape == (N2, dim_h2)
    assert jnp.allclose(out2, ref2, atol=1e-3, rtol=1e-3), "stream mismatch"

    print("KERNEL_OK")
</pallas_src>

<mosaic_0001>
module attributes {stable_mosaic.version = 11 : i64} {
  func.func @_ffn_kernel_fused(%arg0: i32, %arg1: memref<8x32xf32, #tpu.memory_space<vmem>>, %arg2: memref<1x32xf32, #tpu.memory_space<vmem>>, %arg3: memref<1x32xf32, #tpu.memory_space<vmem>>, %arg4: memref<32x32xf32, #tpu.memory_space<vmem>>, %arg5: memref<1x32xf32, #tpu.memory_space<vmem>>, %arg6: memref<32x32xf32, #tpu.memory_space<vmem>>, %arg7: memref<1x32xf32, #tpu.memory_space<vmem>>, %arg8: memref<8x32xf32, #tpu.memory_space<vmem>>) attributes {dimension_semantics = [#tpu.dimension_semantics<parallel>], iteration_bounds = array<i64: 1>, scalar_prefetch = 0 : i64, scratch_operands = 0 : i64, tpu.core_type = #tpu.core_type<tc>, window_params = [{transform_indices = @transform_0, window_bounds = array<i64: 8, 32>}, {pipeline_mode = #tpu.pipeline_mode<synchronous>, transform_indices = @transform_1, window_bounds = array<i64: 1, 32>}, {pipeline_mode = #tpu.pipeline_mode<synchronous>, transform_indices = @transform_2, window_bounds = array<i64: 1, 32>}, {pipeline_mode = #tpu.pipeline_mode<synchronous>, transform_indices = @transform_3, window_bounds = array<i64: 32, 32>}, {pipeline_mode = #tpu.pipeline_mode<synchronous>, transform_indices = @transform_4, window_bounds = array<i64: 1, 32>}, {pipeline_mode = #tpu.pipeline_mode<synchronous>, transform_indices = @transform_5, window_bounds = array<i64: 32, 32>}, {pipeline_mode = #tpu.pipeline_mode<synchronous>, transform_indices = @transform_6, window_bounds = array<i64: 1, 32>}, {transform_indices = @transform_7, window_bounds = array<i64: 8, 32>}]} {
    %c0 = arith.constant 0 : index
    %c0_0 = arith.constant 0 : index
    %0 = vector.load %arg1[%c0, %c0_0] : memref<8x32xf32, #tpu.memory_space<vmem>>, vector<8x32xf32>
    %cst = arith.constant dense<0.000000e+00> : vector<8xf32>
    %1 = vector.multi_reduction <add>, %0, %cst [1] : vector<8x32xf32> to vector<8xf32>
    %2 = vector.shape_cast %1 : vector<8xf32> to vector<8x1xf32>
    %cst_1 = arith.constant 3.200000e+01 : f32
    %3 = vector.broadcast %cst_1 : f32 to vector<8x1xf32>
    %4 = arith.divf %2, %3 : vector<8x1xf32>
    %5 = vector.broadcast %4 : vector<8x1xf32> to vector<8x32xf32>
    %6 = arith.subf %0, %5 : vector<8x32xf32>
    %7 = arith.mulf %6, %6 : vector<8x32xf32>
    %cst_2 = arith.constant dense<0.000000e+00> : vector<8xf32>
    %8 = vector.multi_reduction <add>, %7, %cst_2 [1] : vector<8x32xf32> to vector<8xf32>
    %9 = vector.shape_cast %8 : vector<8xf32> to vector<8x1xf32>
    %cst_3 = arith.constant 3.200000e+01 : f32
    %10 = vector.broadcast %cst_3 : f32 to vector<8x1xf32>
    %11 = arith.divf %9, %10 : vector<8x1xf32>
    %cst_4 = arith.constant 9.99999974E-6 : f32
    %12 = vector.broadcast %cst_4 : f32 to vector<8x1xf32>
    %13 = arith.addf %11, %12 : vector<8x1xf32>
    %14 = math.rsqrt %13 : vector<8x1xf32>
    %15 = vector.broadcast %14 : vector<8x1xf32> to vector<8x32xf32>
    %16 = arith.mulf %6, %15 : vector<8x32xf32>
    %c0_5 = arith.constant 0 : index
    %c0_6 = arith.constant 0 : index
    %17 = vector.load %arg2[%c0_5, %c0_6] : memref<1x32xf32, #tpu.memory_space<vmem>>, vector<1x32xf32>
    %18 = vector.broadcast %17 : vector<1x32xf32> to vector<8x32xf32>
    %19 = arith.mulf %16, %18 : vector<8x32xf32>
    %c0_7 = arith.constant 0 : index
    %c0_8 = arith.constant 0 : index
    %20 = vector.load %arg3[%c0_7, %c0_8] : memref<1x32xf32, #tpu.memory_space<vmem>>, vector<1x32xf32>
    %21 = vector.broadcast %20 : vector<1x32xf32> to vector<8x32xf32>
    %22 = arith.addf %19, %21 : vector<8x32xf32>
    %c0_9 = arith.constant 0 : index
    %c0_10 = arith.constant 0 : index
    %23 = vector.load %arg4[%c0_9, %c0_10] : memref<32x32xf32, #tpu.memory_space<vmem>>, vector<32x32xf32>
    %cst_11 = arith.constant dense<0.000000e+00> : vector<8x32xf32>
    %24 = tpu.matmul %22, %23, %cst_11 {dimension_numbers = #tpu.dot_dimension_numbers<[1], [0], [0], [1], [0, 0, 1, 1], [], []>} : vector<8x32xf32>, vector<32x32xf32>, vector<8x32xf32> -> vector<8x32xf32>
    %c0_12 = arith.constant 0 : index
    %c0_13 = arith.constant 0 : index
    %25 = vector.load %arg5[%c0_12, %c0_13] : memref<1x32xf32, #tpu.memory_space<vmem>>, vector<1x32xf32>
    %26 = vector.broadcast %25 : vector<1x32xf32> to vector<8x32xf32>
    %27 = arith.addf %24, %26 : vector<8x32xf32>
    %cst_14 = arith.constant 5.000000e-01 : f32
    %28 = vector.broadcast %cst_14 : f32 to vector<8x32xf32>
    %29 = arith.mulf %28, %27 : vector<8x32xf32>
    %cst_15 = arith.constant 0.707106769 : f32
    %30 = vector.broadcast %cst_15 : f32 to vector<8x32xf32>
    %31 = arith.mulf %27, %30 : vector<8x32xf32>
    %32 = math.erf %31 : vector<8x32xf32>
    %cst_16 = arith.constant 1.000000e+00 : f32
    %33 = vector.broadcast %cst_16 : f32 to vector<8x32xf32>
    %34 = arith.addf %33, %32 : vector<8x32xf32>
    %35 = arith.mulf %29, %34 : vector<8x32xf32>
    %c0_17 = arith.constant 0 : index
    %c0_18 = arith.constant 0 : index
    %36 = vector.load %arg6[%c0_17, %c0_18] : memref<32x32xf32, #tpu.memory_space<vmem>>, vector<32x32xf32>
    %cst_19 = arith.constant dense<0.000000e+00> : vector<8x32xf32>
    %37 = tpu.matmul %35, %36, %cst_19 {dimension_numbers = #tpu.dot_dimension_numbers<[1], [0], [0], [1], [0, 0, 1, 1], [], []>} : vector<8x32xf32>, vector<32x32xf32>, vector<8x32xf32> -> vector<8x32xf32>
    %c0_20 = arith.constant 0 : index
    %c0_21 = arith.constant 0 : index
    %38 = vector.load %arg7[%c0_20, %c0_21] : memref<1x32xf32, #tpu.memory_space<vmem>>, vector<1x32xf32>
    %39 = vector.broadcast %38 : vector<1x32xf32> to vector<8x32xf32>
    %40 = arith.addf %37, %39 : vector<8x32xf32>
    %41 = arith.addf %40, %0 : vector<8x32xf32>
    %c0_22 = arith.constant 0 : index
    %c0_23 = arith.constant 0 : index
    %42 = vector.load %arg8[%c0_22, %c0_23] : memref<8x32xf32, #tpu.memory_space<vmem>>, vector<8x32xf32>
    tpu.vector_store %arg8[%c0_22, %c0_23], %41 {strides = array<i32>} : memref<8x32xf32, #tpu.memory_space<vmem>>, vector<8x32xf32>,
    return
  }
  func.func @transform_0(%arg0: i32) -> (i32, i32) {
    %c0_i32 = arith.constant 0 : i32
    %c0_i32_0 = arith.constant 0 : i32
    return %arg0, %c0_i32 : i32, i32
  }
  func.func @transform_1(%arg0: i32) -> (i32, i32) {
    %c0_i32 = arith.constant 0 : i32
    %c0_i32_0 = arith.constant 0 : i32
    %c0_i32_1 = arith.constant 0 : i32
    return %c0_i32, %c0_i32_0 : i32, i32
  }
  func.func @transform_2(%arg0: i32) -> (i32, i32) {
    %c0_i32 = arith.constant 0 : i32
    %c0_i32_0 = arith.constant 0 : i32
    %c0_i32_1 = arith.constant 0 : i32
    return %c0_i32, %c0_i32_0 : i32, i32
  }
  func.func @transform_3(%arg0: i32) -> (i32, i32) {
    %c0_i32 = arith.constant 0 : i32
    %c0_i32_0 = arith.constant 0 : i32
    %c0_i32_1 = arith.constant 0 : i32
    return %c0_i32, %c0_i32_0 : i32, i32
  }
  func.func @transform_4(%arg0: i32) -> (i32, i32) {
    %c0_i32 = arith.constant 0 : i32
    %c0_i32_0 = arith.constant 0 : i32
    %c0_i32_1 = arith.constant 0 : i32
    return %c0_i32, %c0_i32_0 : i32, i32
  }
  func.func @transform_5(%arg0: i32) -> (i32, i32) {
    %c0_i32 = arith.constant 0 : i32
    %c0_i32_0 = arith.constant 0 : i32
    %c0_i32_1 = arith.constant 0 : i32
    return %c0_i32, %c0_i32_0 : i32, i32
  }
  func.func @transform_6(%arg0: i32) -> (i32, i32) {
    %c0_i32 = arith.constant 0 : i32
    %c0_i32_0 = arith.constant 0 : i32
    %c0_i32_1 = arith.constant 0 : i32
    return %c0_i32, %c0_i32_0 : i32, i32
  }
  func.func @transform_7(%arg0: i32) -> (i32, i32) {
    %c0_i32 = arith.constant 0 : i32
    %c0_i32_0 = arith.constant 0 : i32
    return %arg0, %c0_i32 : i32, i32
  }
}

</mosaic_0001>

<bundles_post_ra>
// kernel: tpu_custom_call.1
= control target key start
LH: loop header
LB: loop body
LE: loop exit
PB: predicated region body
PF: predicated region fallthrough
CT: control target
= control target key end

     0   :  { %12 = vsyncpa [#allocation3], 0  ;;  %s566_s0 = inlined_call_operand.hbm [shape: f32[8,32], index: 0, kind: input, shape index: {}]   ;;  %s567_s1 = inlined_call_operand.vmem [shape: f32[1,32], index: 1, kind: input, shape index: {}]   ;;  %s568_s2 = inlined_call_operand.vmem [shape: f32[1,32], index: 2, kind: input, shape index: {}]   ;;  %s569_s3 = inlined_call_operand.hbm [shape: f32[32,32], index: 3, kind: input, shape index: {}]   ;;  %s570_s4 = inlined_call_operand.vmem [shape: f32[1,32], index: 4, kind: input, shape index: {}]   ;;  %s571_s5 = inlined_call_operand.hbm [shape: f32[32,32], index: 5, kind: input, shape index: {}]   ;;  %s572_s6 = inlined_call_operand.vmem [shape: f32[1,32], index: 6, kind: input, shape index: {}]   ;;  %s573_s7 = inlined_call_operand.hbm [shape: f32[8,32], index: 7, kind: output, shape index: {}]  }
   0x1   :  { %13 = vsyncpa [#allocation6], 0 }
   0x2   :  { %14 = vsyncpa [#allocation4], 0  ;;  %s446_s24 = smov [#allocation5]   ;;  %s352_s28 = scalar_lea.hbm %s569_s3, 512 }
   0x3   :  { %s34_s25 = sshll.u32 %s446_s24, 4  ;;  %p353_p0 = scmp.ne.s32.totalorder %s569_s3, %s352_s28  ;;  %s35_s25 = int_to_ptr.vmem [resolvable:$true] %s34_s25 }
   0x4   :  { %p356_p1 = scmp.lt.u32.totalorder %s352_s28, %s569_s3 }
   0x6   :  { %p358_p2 = pnand %p356_p1, %p353_p0 }
   0x8   :  { %361 = shalt.err (!%p358_p2)
}
   0x9   :  { %s362_s10 = scalar_lea.vmem %s35_s25, 512  ;;  %p367_p4 = scmp.lt.s32.totalorder %s35_s25, %s35_s25 }
   0xa   :  { %p363_p3 = scmp.ne.s32.totalorder %s35_s25, %s362_s10  ;;  %p368_p5 = scmp.lt.s32.totalorder %s362_s10, %s362_s10 }
   0xc   :  { %p369_p6 = por %p368_p5, %p367_p4 }
   0xe   :  { %p370_p7 = pnand %p369_p6, %p363_p3 }
  0x10   :  { %373 = shalt.err (!%p370_p7)
}
  0x11   :  { %s447_s11 = smov 128   ;;  %s448_s12 = smov 8  }
  0x12   :  { %40 = dma.hbm_to_vmem [thread:$0]  %s569_s3, 512, %s35_s25, [#allocation6], %s447_s11, %s447_s11, %s448_s12  }
  0x13   :  { %s449_s15 = smov [#allocation2]   ;;  %s450_s17 = smov [#allocation7]  }
  0x14   :  { %s21_s16 = sshll.u32 %s449_s15, 4  ;;  %s48_s18 = sshll.u32 %s450_s17, 4  ;;  %s22_s16 = int_to_ptr.vmem [resolvable:$true] %s21_s16  ;;  %s49_s18 = int_to_ptr.vmem [resolvable:$true] %s48_s18 }
  0x15   :  { %s374_s21 = scalar_lea.hbm %s566_s0, 128 }
  0x16   :  { %p375_p8 = scmp.ne.s32.totalorder %s566_s0, %s374_s21  ;;  %p378_p9 = scmp.lt.u32.totalorder %s374_s21, %s566_s0 }
  0x18   :  { %p380_p10 = pnand %p378_p9, %p375_p8 }
  0x1a   :  { %383 = shalt.err (!%p380_p10)
}
  0x1b   :  { %s384_s3 = scalar_lea.vmem %s22_s16, 128  ;;  %p389_p12 = scmp.lt.s32.totalorder %s22_s16, %s22_s16 }
  0x1c   :  { %p385_p11 = scmp.ne.s32.totalorder %s22_s16, %s384_s3  ;;  %p390_p13 = scmp.lt.s32.totalorder %s384_s3, %s384_s3 }
  0x1e   :  { %p391_p0 = por %p390_p13, %p389_p12 }
  0x20   :  { %p392_p1 = pnand %p391_p0, %p385_p11 }
  0x22   :  { %395 = shalt.err (!%p392_p1)
}
  0x23   :  { %24 = dma.hbm_to_vmem [thread:$0]  %s566_s0, 128, %s22_s16, [#allocation3]  }
  0x24   :  { %s396_s30 = scalar_lea.hbm %s571_s5, 512 }
  0x25   :  { %p397_p2 = scmp.ne.s32.totalorder %s571_s5, %s396_s30  ;;  %p400_p3 = scmp.lt.u32.totalorder %s396_s30, %s571_s5 }
  0x27   :  { %p402_p4 = pnand %p400_p3, %p397_p2 }
  0x29   :  { %405 = shalt.err (!%p402_p4)
}
  0x2a   :  { %s406_s14 = scalar_lea.vmem %s49_s18, 512  ;;  %p411_p6 = scmp.lt.s32.totalorder %s49_s18, %s49_s18 }
  0x2b   :  { %p407_p5 = scmp.ne.s32.totalorder %s49_s18, %s406_s14  ;;  %p412_p7 = scmp.lt.s32.totalorder %s406_s14, %s406_s14 }
  0x2d   :  { %p413_p8 = por %p412_p7, %p411_p6 }
  0x2f   :  { %p414_p9 = pnand %p413_p8, %p407_p5 }
  0x31   :  { %417 = shalt.err (!%p414_p9)
}
  0x32   :  { %54 = dma.hbm_to_vmem [thread:$0]  %s571_s5, 512, %s49_s18, [#allocation6], %s447_s11, %s447_s11, %s448_s12  }
  0x33   :  { %440 = dma.done.wait [#allocation3], 128  }
  0x34   :  { %441 = vsyncadd [#allocation3], 4294967168 }
  0x35   :  { %442 = dma.done.wait [#allocation6], 1024  }
  0x36   :  { %443 = vsyncadd [#allocation6], 4294966272  ;;  %vm67_vm0 = vcmask 261120   ;;  %v66_v0 = vld [vmem:[#allocation2] sm:$0xff]  ;;  %v98_v7 = vld [vmem:[#allocation5] sm:$0xff]  ;;  %v451_v10 = vmov 0.0|0.0  }
  0x37   :  { %v68_v1 = vsel %vm67_vm0, %v66_v0, 0.0  ;;  %v99_v8 = vld [vmem:[#allocation5 + $0x8] sm:$0xff]  ;;  %v100_v9 = vld [vmem:[#allocation5 + $0x10] sm:$0xff]  ;;  %327 = vmatprep.subr.bf16.mxu0 %v451_v10  ;;  %v101_v12 = vld [vmem:[#allocation5 + $0x18] sm:$0xff]  ;;  %vm452_vm1 = vmmov 0   ;;  %v453_v13 = vmov 0.0   ;;  %333 = vmatprep.subr.bf16.mxu1 %v451_v10 }
  0x38   :  { %69 = vadd.xlane.f32.xlu0 %v68_v1  ;;  %v328_v11 = vpack.c.bf16 %v99_v8, %v98_v7  ;;  %313 = vmatprep.mubr.msk.f32.mxu0 %vm452_vm1, %v453_v13  ;;  %v331_v14 = vpack.c.bf16 %v101_v12, %v100_v9  ;;  %v289_v19 = vld [vmem:[%s567_s1] ss:$0 sm:$0xff]  ;;  %v187_v24 = vld [vmem:[#allocation7] sm:$0xff]  ;;  %v188_v25 = vld [vmem:[#allocation7 + $0x8] sm:$0xff]  ;;  %s454_s19 = smov [#allocation8]  }
  0x39   :  { %324 = vmatprep.mubr.msk.f32.mxu1 %vm452_vm1, %v453_v13  ;;  %v290_v21 = vld [vmem:[%s568_s2] ss:$0 sm:$0xff]  ;;  %v334_v26 = vpack.c.bf16 %v188_v25, %v187_v24  ;;  %v189_v27 = vld [vmem:[#allocation7 + $0x10] sm:$0xff]  ;;  %s279_s20 = sshll.u32 %s454_s19, 4  ;;  %s280_s20 = int_to_ptr.vmem [resolvable:$true] %s279_s20 }
  0x3a   :  { %329 = vmatpush3.bf16.msra.mxu0 %v328_v11  ;;  %v190_v28 = vld [vmem:[#allocation7 + $0x18] sm:$0xff]  ;;  %p423_p11 = scmp.lt.s32.totalorder %s280_s20, %s280_s20 }
  0x3b   :  { %330 = vmatprep.subr.bf16.mxu0 %v451_v10  ;;  %335 = vmatpush3.bf16.msra.mxu1 %v334_v26  ;;  %v337_v29 = vpack.c.bf16 %v190_v28, %v189_v27  ;;  %v291_v30 = vld [vmem:[%s570_s4] ss:$0 sm:$0xff]  ;;  %s418_s4 = scalar_lea.vmem %s280_s20, 128 }
  0x3c   :  { %336 = vmatprep.subr.bf16.mxu1 %v451_v10  ;;  %v293_v39 = vld [vmem:[%s572_s6] ss:$0 sm:$0xff]  ;;  %p419_p10 = scmp.ne.s32.totalorder %s280_s20, %s418_s4  ;;  %p424_p12 = scmp.lt.s32.totalorder %s418_s4, %s418_s4 }
  0x3e   :  { %332 = vmatpush3.bf16.msra.mxu0 %v331_v14  ;;  %p425_p13 = por %p424_p12, %p423_p11 }
  0x3f   :  { %338 = vmatpush3.bf16.msra.mxu1 %v337_v29 }
  0x40   :  { %p426_p0 = pnand %p425_p13, %p419_p10 }
  0xc5   :  { %v70_v2 = vpop.xlane.xlu0 %69 }
  0xc6   :  { %v72_v3 = vmul.f32 0.03125, %v70_v2 }
  0xc8   :  { %v73_v4 = vsub.f32 %v66_v0, %v72_v3 }
  0xca   :  { %v74_v5 = vmul.f32 %v73_v4, %v73_v4 }
  0xcc   :  { %v75_v6 = vsel %vm67_vm0, %v74_v5, 0.0 }
  0xcd   :  { %76 = vadd.xlane.f32.xlu0 %v75_v6 }
 0x15a   :  { %v77_v15 = vpop.xlane.xlu0 %76 }
 0x15b   :  { %v78_v16 = vmul.f32 0.03125, %v77_v15 }
 0x15d   :  { %v79_v17 = vadd.f32 1e-05, %v78_v16 }
 0x15f   :  { %348 = vrsqrt.f32 %v79_v17 }
 0x169   :  { %v349_v18 = vpop.eup %348 }
 0x16a   :  { %v81_v20 = vmul.f32 %v349_v18, %v73_v4 }
 0x16c   :  { %v89_v22 = vmul.f32 %v289_v19, %v81_v20 }
 0x16e   :  { %v97_v23 = vadd.f32 %v290_v21, %v89_v22 }
 0x170   :  { %314 = vmatmul.mubr.msk.f32.vlgmr.msra.gmra.mrb[0].mxu0 %vm67_vm0, %v97_v23 }
 0x243   :  { %v178_v31 = vpop.f32.mrb[0].mxu0 }
 0x244   :  { %v179_v32 = vadd.f32 %v291_v30, %v178_v31  ;;  %v315_v33 = vpop.f32.mrb[1].mxu0 }
 0x246   :  { %v183_v34 = vmul.f32 0.70710677, %v179_v32  ;;  %v182_v36 = vmul.f32 0.5, %v179_v32 }
 0x248   :  { %350 = verf.f32 %v183_v34 }
 0x252   :  { %v351_v35 = vpop.eup %350 }
 0x253   :  { %v185_v37 = vadd.f32 1.0, %v351_v35 }
 0x255   :  { %v186_v38 = vmul.f32 %v185_v37, %v182_v36 }
 0x257   :  { %325 = vmatmul.mubr.msk.f32.vlgmr.msra.gmra.mrb[0].mxu1 %vm67_vm0, %v186_v38 }
 0x32a   :  { %v267_v40 = vpop.f32.mrb[0].mxu1 }
 0x32b   :  { %v268_v41 = vadd.f32 %v293_v39, %v267_v40  ;;  %v326_v42 = vpop.f32.mrb[1].mxu1 }
 0x32d   :  { %v271_v43 = vadd.f32 %v268_v41, %v66_v0 }
 0x32f   :  { %272 = vst.msk [vmem:[#allocation8] sm:$0xff] %vm67_vm0, %v271_v43 }
 0x330   :  { %429 = shalt.err (!%p426_p0)
}
 0x331   :  { %s430_s6 = scalar_lea.hbm %s573_s7, 128 }
 0x332   :  { %p431_p1 = scmp.ne.s32.totalorder %s573_s7, %s430_s6  ;;  %p434_p2 = scmp.lt.u32.totalorder %s430_s6, %s573_s7 }
 0x334   :  { %p436_p3 = pnand %p434_p2, %p431_p1 }
 0x336   :  { %439 = shalt.err (!%p436_p3)
}
 0x337   :  { %282 = dma.vmem_to_hbm [thread:$0]  %s280_s20, 128, %s573_s7, [#allocation4]  }
 0x338   :  { %444 = dma.done.wait [#allocation4], 128  }
 0x339   :  { %445 = vsyncadd [#allocation4], 4294967168 }
 0x33a   :  { %286 = vsyncpa [#allocation3], 1 }
 0x33b   :  { %287 = vsyncpa [#allocation6], 1 }
 0x33c   :  { %288 = vsyncpa [#allocation4], 1 }

</bundles_post_ra>
